<compile_context>
chip_gen: v6e
topology: v6e:2x2x1
jax: 0.10.0
libtpu: 0.0.40
codegen_flags: <defaults>
</compile_context>

<pallas_src>
import jax
import jax.numpy as jnp
from jax.experimental import pallas as pl
from jax.experimental.pallas import tpu as pltpu


def _identity2d_kernel(scale_ref, x_ref, o_ref):
    # scale_ref: (block_R, 1), x_ref / o_ref: (block_R, HW)
    # One fused broadcast multiply on the VPU; the op is purely HBM-bandwidth bound.
    o_ref[...] = x_ref[...] * scale_ref[...]


def identity2d(x, weight, weight_mask, *, target_block_bytes=2 * 1024 * 1024):
    """x: (N, C, H, W); weight, weight_mask: (C, 1, 1) -> x * (mask * weight)."""
    N, C, H, W = x.shape
    R, HW = N * C, H * W
    itemsize = jnp.dtype(x.dtype).itemsize

    # Compute the per-channel scale in parameter precision (f32), cast once
    # (matches PyTorch, which multiplies mask*weight in parameter precision).
    scale = (weight_mask.astype(jnp.float32) * weight.astype(jnp.float32)).reshape(C)
    scale_rows = jnp.broadcast_to(scale[None, :], (N, C)).reshape(R, 1).astype(x.dtype)

    # Lane-dense 2-D view: last dim = H*W (full extent -> no (8,128) issues,
    # unmasked wide vector stores).
    x2 = x.reshape(R, HW)

    # dtype-aware sublane granularity for the row (second-to-last) block dim.
    sub = {4: 8, 2: 16, 1: 32}.get(itemsize, 8)

    # Row tile sized for ~target_block_bytes per block; multi-MiB blocks amortize
    # the per-grid-step overhead. Capped at the sublane-rounded row count.
    rows_for_target = max(1, target_block_bytes // max(1, HW * itemsize))
    br = max(sub, (rows_for_target // sub) * sub)
    br = min(br, pl.cdiv(R, sub) * sub)

    grid = (pl.cdiv(R, br),)

    # Explicit VMEM budget: double-buffered input + output blocks + scale + slack.
    # Kept <= 64 MiB so it is valid on v7x (64 MiB physical) as well as v5e/v6e.
    block_bytes = br * HW * itemsize
    vmem_limit = min(64 * 1024 * 1024,
                     max(16 * 1024 * 1024, 4 * block_bytes + (1 << 20)))

    out2 = pl.pallas_call(
        _identity2d_kernel,
        out_shape=jax.ShapeDtypeStruct((R, HW), x.dtype),
        grid=grid,
        in_specs=[
            pl.BlockSpec((br, 1), lambda i: (i, 0)),    # per-row scale (VMEM)
            pl.BlockSpec((br, HW), lambda i: (i, 0)),   # x rows, lane-dense
        ],
        out_specs=pl.BlockSpec((br, HW), lambda i: (i, 0)),
        compiler_params=pltpu.CompilerParams(
            dimension_semantics=("parallel",),
            vmem_limit_bytes=vmem_limit,
        ),
    )(scale_rows, x2)

    return out2.reshape(N, C, H, W)


if __name__ == "__main__":
    key = jax.random.PRNGKey(0)
    N, C, H, W = 2, 4, 16, 16

    x = jax.random.normal(key, (N, C, H, W), dtype=jnp.float32)

    # Deterministic parameter init, mirroring Identity2d.reset_parameters (init.ones_)
    weight = jnp.ones((C, 1, 1), dtype=jnp.float32)
    weight_mask = jnp.ones((C, 1, 1), dtype=jnp.float32)

    out = jax.block_until_ready(identity2d(x, weight, weight_mask))

    # Reference (plain JAX broadcast), same as the PyTorch forward
    ref = x * (weight_mask * weight)[None, :, :, :]
    assert out.shape == x.shape and out.dtype == x.dtype
    assert jnp.allclose(out, ref, atol=1e-6, rtol=1e-6)

    print("KERNEL_OK")
</pallas_src>

<mosaic_0001>
module attributes {stable_mosaic.version = 11 : i64} {
  func.func @_identity2d_kernel(%arg0: i32, %arg1: memref<8x1xf32, #tpu.memory_space<vmem>>, %arg2: memref<8x256xf32, #tpu.memory_space<vmem>>, %arg3: memref<8x256xf32, #tpu.memory_space<vmem>>) attributes {dimension_semantics = [#tpu.dimension_semantics<parallel>], iteration_bounds = array<i64: 1>, scalar_prefetch = 0 : i64, scratch_operands = 0 : i64, tpu.core_type = #tpu.core_type<tc>, window_params = [{transform_indices = @transform_0, window_bounds = array<i64: 8, 1>}, {transform_indices = @transform_1, window_bounds = array<i64: 8, 256>}, {transform_indices = @transform_2, window_bounds = array<i64: 8, 256>}]} {
    %c0 = arith.constant 0 : index
    %c0_0 = arith.constant 0 : index
    %0 = vector.load %arg2[%c0, %c0_0] : memref<8x256xf32, #tpu.memory_space<vmem>>, vector<8x256xf32>
    %c0_1 = arith.constant 0 : index
    %c0_2 = arith.constant 0 : index
    %1 = vector.load %arg1[%c0_1, %c0_2] : memref<8x1xf32, #tpu.memory_space<vmem>>, vector<8x1xf32>
    %2 = vector.broadcast %1 : vector<8x1xf32> to vector<8x256xf32>
    %3 = arith.mulf %0, %2 : vector<8x256xf32>
    %c0_3 = arith.constant 0 : index
    %c0_4 = arith.constant 0 : index
    %4 = vector.load %arg3[%c0_3, %c0_4] : memref<8x256xf32, #tpu.memory_space<vmem>>, vector<8x256xf32>
    tpu.vector_store %arg3[%c0_3, %c0_4], %3 {strides = array<i32>} : memref<8x256xf32, #tpu.memory_space<vmem>>, vector<8x256xf32>,
    return
  }
  func.func @transform_0(%arg0: i32) -> (i32, i32) {
    %c0_i32 = arith.constant 0 : i32
    %c0_i32_0 = arith.constant 0 : i32
    return %arg0, %c0_i32 : i32, i32
  }
  func.func @transform_1(%arg0: i32) -> (i32, i32) {
    %c0_i32 = arith.constant 0 : i32
    %c0_i32_0 = arith.constant 0 : i32
    return %arg0, %c0_i32 : i32, i32
  }
  func.func @transform_2(%arg0: i32) -> (i32, i32) {
    %c0_i32 = arith.constant 0 : i32
    %c0_i32_0 = arith.constant 0 : i32
    return %arg0, %c0_i32 : i32, i32
  }
}

</mosaic_0001>

<bundles_post_ra>
// kernel: tpu_custom_call.1
= control target key start
LH: loop header
LB: loop body
LE: loop exit
PB: predicated region body
PF: predicated region fallthrough
CT: control target
= control target key end

     0   :  { %7 = vsyncpa [#allocation3], 0  ;;  %s126_s0 = inlined_call_operand.vmem [shape: f32[8,1], index: 0, kind: input, shape index: {}]   ;;  %s127_s1 = inlined_call_operand.hbm [shape: f32[8,256], index: 1, kind: input, shape index: {}]   ;;  %s128_s2 = inlined_call_operand.hbm [shape: f32[8,256], index: 2, kind: output, shape index: {}]  }
   0x1   :  { %8 = vsyncpa [#allocation4], 0  ;;  %s99_s9 = smov [#allocation2]  }
   0x2   :  { %s17_s10 = sshll.u32 %s99_s9, 4  ;;  %s18_s10 = int_to_ptr.vmem [resolvable:$true] %s17_s10 }
   0x3   :  { %s63_s11 = scalar_lea.vmem %s18_s10, 256  ;;  %p68_p1 = scmp.lt.s32.totalorder %s18_s10, %s18_s10 }
   0x4   :  { %p64_p0 = scmp.ne.s32.totalorder %s18_s10, %s63_s11  ;;  %p69_p2 = scmp.lt.s32.totalorder %s63_s11, %s63_s11 }
   0x6   :  { %p70_p3 = por %p69_p2, %p68_p1 }
   0x8   :  { %p71_p4 = pnand %p70_p3, %p64_p0 }
   0xa   :  { %74 = shalt.err (!%p71_p4)
}
   0xb   :  { %20 = dma.hbm_to_vmem [thread:$0]  %s127_s1, 256, %s18_s10, [#allocation3]  }
   0xc   :  { %95 = dma.done.wait [#allocation3], 256  }
   0xd   :  { %96 = vsyncadd [#allocation3], 4294967040  ;;  %v100_v0 = vmov 0   ;;  %v26_v1 = vld [vmem:[%s126_s0] sm:$0xff]  ;;  %v25_v3 = vld [vmem:[#allocation2 + $0x8] sm:$0xff]  ;;  %s101_s16 = smov [#allocation5]  }
   0xe   :  { %54 = vset.pattern.permute.xlu0 %v100_v0  ;;  %v24_v2 = vld [vmem:[#allocation2] sm:$0xff]  ;;  %s42_s17 = sshll.u32 %s101_s16, 4  ;;  %s43_s17 = int_to_ptr.vmem [resolvable:$true] %s42_s17 }
   0xf   :  { %29 = vperm.xlu0 %54, %v26_v1   ;;  %s75_s1 = scalar_lea.vmem %s43_s17, 256  ;;  %p80_p6 = scmp.lt.s32.totalorder %s43_s17, %s43_s17 }
  0x10   :  { %p76_p5 = scmp.ne.s32.totalorder %s43_s17, %s75_s1  ;;  %p81_p7 = scmp.lt.s32.totalorder %s75_s1, %s75_s1 }
  0x12   :  { %p82_p8 = por %p81_p7, %p80_p6 }
  0x14   :  { %p83_p9 = pnand %p82_p8, %p76_p5 }
  0x8a   :  { %v30_v4 = vpop.permute.xlu0 %29 }
  0x8b   :  { %v32_v5 = vmul.f32 %v30_v4, %v24_v2  ;;  %v33_v6 = vmul.f32 %v30_v4, %v25_v3 }
  0x8d   :  { %34 = vst [vmem:[#allocation5] sm:$0xff] %v32_v5  ;;  %35 = vst [vmem:[#allocation5 + $0x8] sm:$0xff] %v33_v6 }
  0x8e   :  { %86 = shalt.err (!%p83_p9)
}
  0x8f   :  { %45 = dma.vmem_to_hbm [thread:$0]  %s43_s17, 256, %s128_s2, [#allocation4]  }
  0x90   :  { %97 = dma.done.wait [#allocation4], 256  }
  0x91   :  { %98 = vsyncadd [#allocation4], 4294967040 }
  0x92   :  { %49 = vsyncpa [#allocation3], 1 }
  0x93   :  { %50 = vsyncpa [#allocation4], 1 }

</bundles_post_ra>
